<compile_context>
chip_gen: v7x
topology: tpu7x:2x2x1
jax: 0.10.0
libtpu: 0.0.40
codegen_flags: <defaults>
</compile_context>

<pallas_src>
import math

import jax
import jax.numpy as jnp
from jax import lax
from jax.experimental import pallas as pl
from jax.experimental.pallas import tpu as pltpu


# -----------------------------------------------------------------------------
# 1) Table build: row-tiled, hoisted column math, one sin per element.
# -----------------------------------------------------------------------------
def _build_table_kernel(col_ref, out_ref):
    # col_ref: (2, emb_width)  row 0 = inv_timescales (sin half | cos half)
    #                          row 1 = phase offset (0 | pi/2), since
    #                          cos(x) == sin(x + pi/2)
    # out_ref: (tile_rows, emb_width) block of the table
    rows, width = out_ref.shape
    row0 = (pl.program_id(0) * rows).astype(jnp.float32)
    t = lax.broadcasted_iota(jnp.int32, (rows, width), 0).astype(jnp.float32) + row0
    inv_ts = col_ref[0:1, :]            # (1, width), broadcast along sublanes
    phase = col_ref[1:2, :]
    out_ref[...] = jnp.sin(t * inv_ts + phase)   # one FMA + one sin per element


def build_time_table(len_max, emb_width, max_tile_rows=512,
                     vmem_budget_bytes=12 << 20):
    """Compute the (len_max, emb_width) sinusoidal buffer (f32) in Pallas."""
    num_ts = emb_width // 2
    log_inc = math.log(10000.0) / (num_ts - 1)
    inv_ts = jnp.exp(jnp.arange(num_ts, dtype=jnp.float32) * -log_inc)
    # Row-invariant column parameters, computed ONCE (hoisted out of the kernel).
    col_params = jnp.stack(
        [
            jnp.concatenate([inv_ts, inv_ts]),
            jnp.concatenate([jnp.zeros((num_ts,), jnp.float32),
                             jnp.full((num_ts,), 0.5 * math.pi, jnp.float32)]),
        ]
    )  # (2, emb_width)

    # Largest multiple-of-8 row tile that keeps a double-buffered output block
    # under the scoped-VMEM budget (full extent if the table is small).
    bytes_per_row = emb_width * 4
    tile = min(len_max, max_tile_rows,
               max(8, vmem_budget_bytes // (2 * bytes_per_row)))
    if tile < len_max:
        tile = max(8, (tile // 8) * 8)
    grid = (pl.cdiv(len_max, tile),)

    return pl.pallas_call(
        _build_table_kernel,
        out_shape=jax.ShapeDtypeStruct((len_max, emb_width), jnp.float32),
        grid_spec=pltpu.PrefetchScalarGridSpec(
            num_scalar_prefetch=0,
            grid=grid,
            in_specs=[pl.BlockSpec((2, emb_width), lambda i: (0, 0))],
            out_specs=pl.BlockSpec((tile, emb_width), lambda i: (i, 0)),
        ),
        compiler_params=pltpu.CompilerParams(
            dimension_semantics=("parallel",),  # v7x: shard row tiles across TCs
        ),
    )(col_params)


# -----------------------------------------------------------------------------
# 2) forward(t): batched row gather with scalar-prefetched indices.
# -----------------------------------------------------------------------------
_LOOKUP_ROWS = 8  # rows gathered per grid step -> sublane-dense output stores


def _gather_rows_kernel(t_ref, table_ref, out_ref):
    # t_ref:     SMEM (n_pad,) int32 clamped timestep indices (scalar prefetch)
    # table_ref: full (len_max, emb_width) table in VMEM (constant index_map)
    # out_ref:   (8, emb_width) output block
    i = pl.program_id(0)
    for j in range(_LOOKUP_ROWS):                       # static unroll
        r = t_ref[i * _LOOKUP_ROWS + j]
        out_ref[pl.ds(j, 1), :] = table_ref[pl.ds(r, 1), :]


def time_encoding_lookup(table, ts):
    """Gather rows `ts` (scalar or int vector) of `table` -> (n, emb_width)."""
    len_max, width = table.shape
    ts = jnp.atleast_1d(jnp.asarray(ts, dtype=jnp.int32))
    n = ts.shape[0]
    n_pad = _LOOKUP_ROWS * pl.cdiv(n, _LOOKUP_ROWS)
    ts_pad = jnp.clip(jnp.pad(ts, (0, n_pad - n)), 0, len_max - 1)

    out = pl.pallas_call(
        _gather_rows_kernel,
        out_shape=jax.ShapeDtypeStruct((n_pad, width), jnp.float32),
        grid_spec=pltpu.PrefetchScalarGridSpec(
            num_scalar_prefetch=1,
            grid=(n_pad // _LOOKUP_ROWS,),
            # Whole table resident in VMEM with a constant index_map: fetched
            # once and reused across every grid step.
            # TODO(synk): for tables too large for VMEM, switch to per-lookup
            # (8, width) blocks indexed by ts[i] // 8 with in-kernel row select.
            in_specs=[pl.BlockSpec((len_max, width), lambda i, t_ref: (0, 0))],
            out_specs=pl.BlockSpec((_LOOKUP_ROWS, width),
                                   lambda i, t_ref: (i, 0)),
        ),
        compiler_params=pltpu.CompilerParams(
            dimension_semantics=("arbitrary",),
        ),
    )(ts_pad, table)
    return out[:n]


class TimeEncoding:
    """Pallas port of the PyTorch TimeEncoding module (forward pass only)."""

    def __init__(self, d_model, p=0, len_max=64):
        num_timescales = d_model // 2
        # PyTorch divides by (num_timescales - 1): need at least 2 timescales.
        assert num_timescales >= 2, "d_model must be >= 4"
        self.d_model = d_model
        self.p = p  # dropout prob is unused in forward (matches PyTorch module)
        self.emb_width = 2 * num_timescales  # == d_model for even d_model
        self.renew(len_max)

    def renew(self, new_max_len):
        self.len_max = new_max_len
        self.time_emb = build_time_table(new_max_len, self.emb_width)

    def forward(self, t):
        # Scalar t -> (1, emb_width), i.e. time_emb[t, :].unsqueeze(0).
        # (t must satisfy 0 <= t < len_max; indices are clamped for safety.)
        return time_encoding_lookup(self.time_emb, t)

    def forward_batch(self, ts):
        # Vectorized lookup: (n,) indices -> (n, emb_width); amortizes launch
        # overhead and keeps output stores sublane-dense.
        return time_encoding_lookup(self.time_emb, ts)

    __call__ = forward


# -----------------------------------------------------------------------------
# Pure-JAX reference matching the PyTorch module exactly.
# -----------------------------------------------------------------------------
def time_encoding_reference_table(d_model, len_max=64):
    times = jnp.arange(0, len_max, dtype=jnp.float32)
    num_timescales = d_model // 2
    log_timescale_increment = math.log(10000.0) / (num_timescales - 1)
    inv_timescales = jnp.exp(
        jnp.arange(0, num_timescales, dtype=jnp.float32) * -log_timescale_increment
    )
    scaled_time = times[:, None] * inv_timescales[None, :]
    return jnp.concatenate([jnp.sin(scaled_time), jnp.cos(scaled_time)], axis=1)


if __name__ == "__main__":
    d_model = 32
    len_max = 64

    key = jax.random.PRNGKey(0)
    k1, k2 = jax.random.split(key)
    t = int(jax.random.randint(k1, (), 0, len_max))     # scalar timestep
    ts = jax.random.randint(k2, (5,), 0, len_max)       # batched timesteps

    mod = TimeEncoding(d_model, p=0, len_max=len_max)

    # Check the precomputed buffer itself.
    ref_table = time_encoding_reference_table(d_model, len_max)
    table = jax.block_until_ready(mod.time_emb)
    assert table.shape == ref_table.shape, (table.shape, ref_table.shape)
    assert jnp.allclose(table, ref_table, atol=1e-5, rtol=1e-5)

    # Check forward(t) for a scalar timestep (matches PyTorch (1, d_model)).
    out = jax.block_until_ready(mod(t))
    ref = ref_table[t, :][None, :]
    assert out.shape == (1, d_model), out.shape
    assert jnp.allclose(out, ref, atol=1e-5, rtol=1e-5), (out, ref)

    # Check the batched lookup path.
    out_b = jax.block_until_ready(mod.forward_batch(ts))
    ref_b = ref_table[ts, :]
    assert out_b.shape == (5, d_model), out_b.shape
    assert jnp.allclose(out_b, ref_b, atol=1e-5, rtol=1e-5)

    print("KERNEL_OK")
</pallas_src>

<mosaic_0001>
module attributes {stable_mosaic.version = 11 : i64} {
  func.func @_build_table_kernel(%arg0: i32, %arg1: memref<2x32xf32, #tpu.memory_space<vmem>>, %arg2: memref<64x32xf32, #tpu.memory_space<vmem>>) attributes {dimension_semantics = [#tpu.dimension_semantics<parallel>], iteration_bounds = array<i64: 1>, scalar_prefetch = 0 : i64, scratch_operands = 0 : i64, tpu.core_type = #tpu.core_type<tc>, window_params = [{pipeline_mode = #tpu.pipeline_mode<synchronous>, transform_indices = @transform_0, window_bounds = array<i64: 2, 32>}, {transform_indices = @transform_1, window_bounds = array<i64: 64, 32>}]} {
    %c64_i32 = arith.constant 64 : i32
    %0 = arith.muli %arg0, %c64_i32 : i32
    %1 = arith.sitofp %0 : i32 to f32
    %2 = tpu.iota {dimensions = array<i32: 0>} : vector<64x32xi32>
    %3 = arith.sitofp %2 : vector<64x32xi32> to vector<64x32xf32>
    %4 = vector.broadcast %1 : f32 to vector<64x32xf32>
    %5 = arith.addf %3, %4 : vector<64x32xf32>
    %c0 = arith.constant 0 : index
    %c0_0 = arith.constant 0 : index
    %6 = vector.load %arg1[%c0, %c0_0] : memref<2x32xf32, #tpu.memory_space<vmem>>, vector<1x32xf32>
    %c1 = arith.constant 1 : index
    %c0_1 = arith.constant 0 : index
    %7 = vector.load %arg1[%c1, %c0_1] : memref<2x32xf32, #tpu.memory_space<vmem>>, vector<1x32xf32>
    %8 = vector.broadcast %6 : vector<1x32xf32> to vector<64x32xf32>
    %9 = arith.mulf %5, %8 : vector<64x32xf32>
    %10 = vector.broadcast %7 : vector<1x32xf32> to vector<64x32xf32>
    %11 = arith.addf %9, %10 : vector<64x32xf32>
    %12 = math.sin %11 : vector<64x32xf32>
    %c0_2 = arith.constant 0 : index
    %c0_3 = arith.constant 0 : index
    %13 = vector.load %arg2[%c0_2, %c0_3] : memref<64x32xf32, #tpu.memory_space<vmem>>, vector<64x32xf32>
    tpu.vector_store %arg2[%c0_2, %c0_3], %12 {strides = array<i32>} : memref<64x32xf32, #tpu.memory_space<vmem>>, vector<64x32xf32>,
    return
  }
  func.func @transform_0(%arg0: i32) -> (i32, i32) {
    %c0_i32 = arith.constant 0 : i32
    %c0_i32_0 = arith.constant 0 : i32
    %c0_i32_1 = arith.constant 0 : i32
    return %c0_i32, %c0_i32_0 : i32, i32
  }
  func.func @transform_1(%arg0: i32) -> (i32, i32) {
    %c0_i32 = arith.constant 0 : i32
    %c0_i32_0 = arith.constant 0 : i32
    return %arg0, %c0_i32 : i32, i32
  }
}

</mosaic_0001>

<bundles_post_ra>
// kernel: tpu_custom_call.1
= control target key start
LH: loop header
LB: loop body
LE: loop exit
PB: predicated region body
PF: predicated region fallthrough
CT: control target
= control target key end

     0   :  { %6 = vsyncpa [#allocation3], 0  ;;  %s1049_s6 = smov [#allocation2]   ;;  %s1804_s0 = inlined_call_operand.hbm [shape: f32[2,32], index: 0, kind: input, shape index: {}]   ;;  %s1805_s1 = inlined_call_operand.vmem [shape: f32[64,32], index: 1, kind: output, shape index: {}]  }
   0x1   :  { %s13_s7 = sshll.u32 %s1049_s6, 4  ;;  %s1025_s10 = scalar_lea.hbm %s1804_s0, 32  ;;  %s14_s7 = int_to_ptr.vmem [resolvable:$true] %s13_s7 }
   0x2   :  { %p1026_p0 = scmp.ne.s32.totalorder %s1804_s0, %s1025_s10  ;;  %p1029_p1 = scmp.lt.u32.totalorder %s1025_s10, %s1804_s0 }
   0x4   :  { %p1031_p2 = pnand %p1029_p1, %p1026_p0 }
   0x6   :  { %1034 = shalt.err (!%p1031_p2)
}
   0x7   :  { %s1035_s15 = scalar_lea.vmem %s14_s7, 32  ;;  %p1040_p4 = scmp.lt.s32.totalorder %s14_s7, %s14_s7 }
   0x8   :  { %p1036_p3 = scmp.ne.s32.totalorder %s14_s7, %s1035_s15  ;;  %p1041_p5 = scmp.lt.s32.totalorder %s1035_s15, %s1035_s15 }
   0xa   :  { %p1042_p6 = por %p1041_p5, %p1040_p4 }
   0xc   :  { %p1043_p7 = pnand %p1042_p6, %p1036_p3 }
   0xe   :  { %1046 = shalt.err (!%p1043_p7)
}
   0xf   :  { %16 = dma.hbm_to_vmem [thread:$0]  %s1804_s0, 32, %s14_s7, [#allocation3]  }
  0x10   :  { %1047 = dma.done.wait [#allocation3], 32  }
  0x11   :  { %1048 = vsyncadd [#allocation3], 4294967264  ;;  %v22_v0 = vlaneseq  ;;  %v1084_v9 = vld [vmem:[#allocation2] ss:$0 sm:$0xff]  ;;  %v1086_v10 = vld [vmem:[#allocation2 + $0x1] ss:$0 sm:$0xff] }
  0x12   :  { %v1050_v51 = vmov 683565275   ;;  %v1051_v53 = vmov 2475754826   ;;  %v1052_v55 = vmov 2131351028  }
  0x13   :  { %v1078_v1 = vshrl.u32 %v22_v0, 7  ;;  %v1053_v57 = vmov 2102212464   ;;  %v1054_v59 = vmov 920167782  }
  0x15   :  { %v24_v2 = vadd.s32 8, %v1078_v1  ;;  %v25_v3 = vadd.s32 16, %v1078_v1  ;;  %v30_v4 = vadd.s32 56, %v1078_v1  ;;  %v31_v5 = vcvt.s32.f32 %v1078_v1 }
  0x16   :  { %v26_v21 = vadd.s32 24, %v1078_v1  ;;  %v1115_v38 = vadd.s32 32, %v1078_v1  ;;  %v1118_v39 = vadd.s32 40, %v1078_v1 }
  0x17   :  { %v32_v6 = vcvt.s32.f32 %v24_v2  ;;  %v33_v7 = vcvt.s32.f32 %v25_v3  ;;  %v38_v8 = vcvt.s32.f32 %v30_v4  ;;  %v54_v11 = vmul.f32 %v1084_v9, %v31_v5 }
  0x18   :  { %v34_v30 = vcvt.s32.f32 %v26_v21  ;;  %v1055_v4 = vmov 1326507024  }
  0x19   :  { %v55_v12 = vmul.f32 %v1084_v9, %v32_v6  ;;  %v56_v13 = vmul.f32 %v1084_v9, %v33_v7  ;;  %v61_v14 = vmul.f32 %v1084_v9, %v38_v8  ;;  %v1093_v15 = vadd.f32 %v1086_v10, %v54_v11 }
  0x1a   :  { %v1121_v40 = vmul.f32 %v1084_v9, %v34_v30 }
  0x1b   :  { %v1096_v16 = vadd.f32 %v1086_v10, %v55_v12  ;;  %v1099_v17 = vadd.f32 %v1086_v10, %v56_v13  ;;  %v1102_v18 = vadd.f32 %v1086_v10, %v61_v14  ;;  %v74_v19 = vand.u32 2147483647, %v1093_v15 }
  0x1c   :  { %v77_v20 = vand.u32 2139095040, %v1093_v15 }
  0x1d   :  { %v178_v22 = vand.u32 2147483647, %v1096_v16  ;;  %v181_v23 = vand.u32 2139095040, %v1096_v16  ;;  %v81_v25 = vand.u32 8388607, %v74_v19  ;;  %v285_v28 = vand.u32 2139095040, %v1099_v17 }
  0x1e   :  { %v78_v24 = vshrl.u32 %v77_v20, 23  ;;  %v282_v45 = vand.u32 2147483647, %v1099_v17 }
  0x1f   :  { %v182_v26 = vshrl.u32 %v181_v23, 23  ;;  %v185_v27 = vand.u32 8388607, %v178_v22  ;;  %v286_v32 = vshrl.u32 %v285_v28, 23  ;;  %v82_v34 = vor.u32 8388608, %v81_v25 }
  0x20   :  { %v922_v29 = vadd.s32 4294967169, %v78_v24 }
  0x21   :  { %v926_v31 = vadd.s32 4294967169, %v182_v26  ;;  %v186_v35 = vor.u32 8388608, %v185_v27  ;;  %v930_v37 = vadd.s32 4294967169, %v286_v32  ;;  %v1124_v46 = vshll.u32 %v82_v34, 8 }
  0x22   :  { %v84_v33 = vadd.s32 1, %v922_v29 }
  0x23   :  { %v188_v36 = vadd.s32 1, %v926_v31  ;;  %v1126_v48 = vshll.u32 %v186_v35, 8  ;;  %v1128_v49 = vadd.s32 1, %v930_v37 }
  0x24   :  { %vm85_vm0 = vcmp.gt.s32.totalorder %v84_v33, 0 }
  0x25   :  { %v86_v41 = vsel %vm85_vm0, %v84_v33, 0  ;;  %vm189_vm1 = vcmp.gt.s32.totalorder %v188_v36, 0  ;;  %vm293_vm6 = vcmp.gt.s32.totalorder %v1128_v49, 0 }
  0x26   :  { %v87_v42 = vshrl.u32 %v86_v41, 5  ;;  %v88_v43 = vand.u32 31, %v86_v41  ;;  %v190_v44 = vsel %vm189_vm1, %v188_v36, 0 }
  0x27   :  { %v192_v47 = vand.u32 31, %v190_v44  ;;  %v1135_v61 = vshrl.u32 %v190_v44, 5 }
  0x28   :  { %v89_v50 = vsub.s32 32, %v88_v43  ;;  %v91_v52 = vshll.u32 %v1050_v51, %v88_v43  ;;  %v94_v54 = vshll.u32 %v1051_v53, %v88_v43  ;;  %v97_v56 = vshll.u32 %v1052_v55, %v88_v43 }
  0x29   :  { %v100_v58 = vshll.u32 %v1053_v57, %v88_v43  ;;  %v103_v60 = vshll.u32 %v1054_v59, %v88_v43  ;;  %vm106_vm2 = vcmp.lt.s32.totalorder %v87_v42, 1  ;;  %vm107_vm3 = vcmp.lt.s32.totalorder %v87_v42, 2 }
  0x2a   :  { %v90_v62 = vshrl.u32 %v1050_v51, %v89_v50  ;;  %v92_v63 = vshrl.u32 %v1051_v53, %v89_v50  ;;  %v95_v0 = vshrl.u32 %v1052_v55, %v89_v50  ;;  %v98_v2 = vshrl.u32 %v1053_v57, %v89_v50 }
  0x2b   :  { %v101_v3 = vshrl.u32 %v1054_v59, %v89_v50  ;;  %v104_v5 = vshrl.u32 %v1055_v4, %v89_v50  ;;  %vm109_vm4 = vcmp.lt.s32.totalorder %v87_v42, 4  ;;  %v193_v11 = vsub.s32 32, %v192_v47 }
  0x2c   :  { %v93_v6 = vor.u32 %v92_v63, %v91_v52  ;;  %v96_v7 = vor.u32 %v95_v0, %v94_v54  ;;  %v99_v8 = vor.u32 %v98_v2, %v97_v56  ;;  %vm108_vm5 = vcmp.lt.s32.totalorder %v87_v42, 3 }
  0x2d   :  { %v102_v12 = vor.u32 %v101_v3, %v100_v58  ;;  %v105_v13 = vor.u32 %v104_v5, %v103_v60  ;;  %v195_v14 = vshll.u32 %v1050_v51, %v192_v47  ;;  %v198_v28 = vshll.u32 %v1051_v53, %v192_v47 }
  0x2e   :  { %v110_v20 = vsel %vm106_vm2, %v90_v62, %v93_v6  ;;  %v111_v21 = vsel %vm109_vm4, %v99_v8, 2102212464  ;;  %v114_v23 = vsel %vm106_vm2, %v93_v6, %v96_v7  ;;  %v118_v24 = vsel %vm106_vm2, %v96_v7, %v99_v8 }
  0x2f   :  { %v112_v25 = vsel %vm108_vm5, %v96_v7, %v111_v21  ;;  %v115_v26 = vsel %vm109_vm4, %v102_v12, 920167782  ;;  %v119_v27 = vsel %vm109_vm4, %v105_v13, 1326507024  ;;  %v194_v31 = vshrl.u32 %v1050_v51, %v193_v11 }
  0x30   :  { %v116_v29 = vsel %vm108_vm5, %v99_v8, %v115_v26  ;;  %v120_v30 = vsel %vm108_vm5, %v102_v12, %v119_v27  ;;  %v196_v32 = vshrl.u32 %v1051_v53, %v193_v11  ;;  %v113_v33 = vsel %vm107_vm3, %v110_v20, %v112_v25 }
  0x31   :  { %v117_v34 = vsel %vm107_vm3, %v114_v23, %v116_v29  ;;  %v121_v35 = vsel %vm107_vm3, %v118_v24, %v120_v30  ;;  %v199_v36 = vshrl.u32 %v1052_v55, %v193_v11  ;;  %v201_v54 = vshll.u32 %v1052_v55, %v192_v47 }
  0x32   :  { %v1156_v37 = vmul.u32.u64.low %v1124_v46, %v121_v35  ;;  %v1157_v41 = vmul.u32.u64.high %v1124_v46, %v121_v35, %v1156_v37  ;;  %v1160_v43 = vmul.u32.u64.low %v1124_v46, %v117_v34  ;;  %v1161_v44 = vmul.u32.u64.high %v1124_v46, %v117_v34, %v1160_v43 }
  0x33   :  { %v197_v50 = vor.u32 %v196_v32, %v195_v14  ;;  %v200_v52 = vor.u32 %v199_v36, %v198_v28  ;;  %v202_v56 = vshrl.u32 %v1053_v57, %v193_v11  ;;  %v204_v42 = vshll.u32 %v1053_v57, %v192_v47 }
  0x34   :  { %v205_v58 = vshrl.u32 %v1054_v59, %v193_v11  ;;  %v207_v60 = vshll.u32 %v1054_v59, %v192_v47  ;;  %v208_v62 = vshrl.u32 %v1055_v4, %v193_v11  ;;  %v129_v63 = vmul.u32 %v1124_v46, %v113_v33 }
  0x35   :  { %v203_v0 = vor.u32 %v202_v56, %v201_v54  ;;  %vm210_vm7 = vcmp.lt.s32.totalorder %v1135_v61, 1  ;;  %vm211_vm8 = vcmp.lt.s32.totalorder %v1135_v61, 2  ;;  %vm131_vm9 = vc.u32 %v1157_v41, %v1160_v43 }
  0x36   :  { %v132_v2 = vadd.s32 1, %v1161_v44  ;;  %v206_v3 = vor.u32 %v205_v58, %v204_v42  ;;  %vm212_vm10 = vcmp.lt.s32.totalorder %v1135_v61, 3  ;;  %v209_v5 = vor.u32 %v208_v62, %v207_v60 }
  0x37   :  { %vm213_vm11 = vcmp.lt.s32.totalorder %v1135_v61, 4  ;;  %v214_v47 = vsel %vm210_vm7, %v194_v31, %v197_v50  ;;  %v218_v6 = vsel %vm210_vm7, %v197_v50, %v200_v52  ;;  %v222_v11 = vsel %vm210_vm7, %v200_v52, %v203_v0 }
  0x38   :  { %v133_v46 = vsel %vm131_vm9, %v132_v2, %v1161_v44  ;;  %v215_v7 = vsel %vm213_vm11, %v203_v0, 2102212464  ;;  %v219_v8 = vsel %vm213_vm11, %v206_v3, 920167782  ;;  %v223_v20 = vsel %vm213_vm11, %v209_v5, 1326507024 }
  0x39   :  { %v134_v12 = vadd.s32 %v133_v46, %v129_v63  ;;  %v216_v13 = vsel %vm212_vm10, %v200_v52, %v215_v7  ;;  %v220_v14 = vsel %vm212_vm10, %v203_v0, %v219_v8  ;;  %v224_v24 = vsel %vm212_vm10, %v206_v3, %v223_v20 }
  0x3a   :  { %v217_v21 = vsel %vm211_vm8, %v214_v47, %v216_v13  ;;  %v221_v23 = vsel %vm211_vm8, %v218_v6, %v220_v14  ;;  %v294_v25 = vsel %vm293_vm6, %v1128_v49, 0  ;;  %v225_v27 = vsel %vm211_vm8, %v222_v11, %v224_v24 }
  0x3b   :  { %v135_v26 = vadd.s32 536870912, %v134_v12  ;;  %v1189_v28 = vmul.u32.u64.low %v1126_v48, %v221_v23  ;;  %v1190_v29 = vmul.u32.u64.high %v1126_v48, %v221_v23, %v1189_v28  ;;  %v1194_v30 = vadd.s32 48, %v1078_v1 }
  0x3c   :  { %v1197_v31 = vmul.u32.u64.low %v1126_v48, %v225_v27  ;;  %v1198_v32 = vmul.u32.u64.high %v1126_v48, %v225_v27, %v1197_v31  ;;  %v289_v33 = vand.u32 8388607, %v282_v45  ;;  %v1204_v49 = vadd.f32 %v1086_v10, %v1121_v40 }
  0x3d   :  { %v1206_v61 = vshrl.u32 %v135_v26, 30  ;;  %v296_v34 = vand.u32 31, %v294_v25  ;;  %v233_v35 = vmul.u32 %v1126_v48, %v217_v21  ;;  %v35_v36 = vcvt.s32.f32 %v1115_v38 }
  0x3e   :  { %v236_v37 = vadd.s32 1, %v1190_v29  ;;  %v36_v50 = vcvt.s32.f32 %v1118_v39  ;;  %v37_v52 = vcvt.s32.f32 %v1194_v30  ;;  %vm235_vm12 = vc.u32 %v1198_v32, %v1189_v28 }
  0x3f   :  { %v137_v1 = vshll.u32 %v1206_v61, 30  ;;  %v297_v44 = vsub.s32 32, %v296_v34  ;;  %v290_v40 = vor.u32 8388608, %v289_v33  ;;  %v1219_v48 = vshrl.u32 %v294_v25, 5 }
  0x40   :  { %v237_v56 = vsel %vm235_vm12, %v236_v37, %v1190_v29  ;;  %v389_v38 = vand.u32 2139095040, %v1204_v49  ;;  %v299_v58 = vshll.u32 %v1050_v51, %v296_v34  ;;  %v302_v62 = vshll.u32 %v1051_v53, %v296_v34 }
  0x41   :  { %v1216_v54 = vsub.s32 %v134_v12, %v137_v1  ;;  %v238_v42 = vadd.s32 %v237_v56, %v233_v35  ;;  %v300_v60 = vshrl.u32 %v1051_v53, %v297_v44  ;;  %v303_v0 = vshrl.u32 %v1052_v55, %v297_v44 }
  0x42   :  { %v305_v2 = vshll.u32 %v1052_v55, %v296_v34  ;;  %v306_v3 = vshrl.u32 %v1053_v57, %v297_v44  ;;  %v1230_v5 = vmul.f32 %v1084_v9, %v35_v36  ;;  %v308_v6 = vshll.u32 %v1053_v57, %v296_v34 }
  0x43   :  { %v140_v63 = vsub.s32 0, %v1216_v54  ;;  %v239_v47 = vadd.s32 536870912, %v238_v42  ;;  %v1233_v46 = vshll.u32 %v290_v40, 8  ;;  %v309_v8 = vshrl.u32 %v1054_v59, %v297_v44 }
  0x44   :  { %vm317_vm13 = vcmp.lt.s32.totalorder %v1219_v48, 4  ;;  %v390_v11 = vshrl.u32 %v389_v38, 23  ;;  %v298_v13 = vshrl.u32 %v1050_v51, %v297_v44  ;;  %v311_v14 = vshll.u32 %v1054_v59, %v296_v34 }
  0x45   :  { %v923_v7 = vmin.u32 %v140_v63, %v1216_v54  ;;  %v1238_v12 = vshrl.u32 %v239_v47, 30  ;;  %v312_v20 = vshrl.u32 %v1055_v4, %v297_v44  ;;  %v301_v23 = vor.u32 %v300_v60, %v299_v58 }
  0x46   :  { %v304_v24 = vor.u32 %v303_v0, %v302_v62  ;;  %v307_v25 = vor.u32 %v306_v3, %v305_v2  ;;  %v310_v27 = vor.u32 %v309_v8, %v308_v6  ;;  %vm314_vm14 = vcmp.lt.s32.totalorder %v1219_v48, 1 }
  0x47   :  { %v142_v21 = vclz %v923_v7  ;;  %v241_v26 = vshll.u32 %v1238_v12, 30  ;;  %vm316_vm15 = vcmp.lt.s32.totalorder %v1219_v48, 3  ;;  %v130_v29 = vadd.s32 %v1160_v43, %v1157_v41 }
  0x48   :  { %v313_v33 = vor.u32 %v312_v20, %v311_v14  ;;  %v319_v34 = vsel %vm317_vm13, %v307_v25, 2102212464  ;;  %vm315_vm0 = vcmp.lt.s32.totalorder %v1219_v48, 2  ;;  %v323_v36 = vsel %vm317_vm13, %v310_v27, 920167782 }
  0x49   :  { %v924_v31 = vadd.s32 4294967294, %v142_v21  ;;  %v1250_v35 = vsub.s32 %v238_v42, %v241_v26  ;;  %v934_v1 = vadd.s32 4294967169, %v390_v11  ;;  %v318_v37 = vsel %vm314_vm14, %v298_v13, %v301_v23 }
  0x4a   :  { %v322_v41 = vsel %vm314_vm14, %v301_v23, %v304_v24  ;;  %v324_v43 = vsel %vm316_vm15, %v307_v25, %v323_v36  ;;  %v320_v56 = vsel %vm316_vm15, %v304_v24, %v319_v34  ;;  %v326_v38 = vsel %vm314_vm14, %v304_v24, %v307_v25 }
  0x4b   :  { %vm925_vm1 = vcmp.lt.s32.totalorder %v924_v31, 0  ;;  %v244_v40 = vsub.s32 0, %v1250_v35  ;;  %v327_v62 = vsel %vm317_vm13, %v313_v33, 1326507024  ;;  %v325_v0 = vsel %vm315_vm0, %v322_v41, %v324_v43 }
  0x4c   :  { %v145_v44 = vsel %vm925_vm1, 0, %v924_v31  ;;  %v328_v2 = vsel %vm316_vm15, %v310_v27, %v327_v62  ;;  %v386_v3 = vand.u32 2147483647, %v1204_v49  ;;  %vm76_vm2 = vcmp.lt.s32.totalorder %v1093_v15, 0 }
  0x4d   :  { %v146_v42 = vsub.s32 32, %v145_v44  ;;  %v147_v58 = vshll.u32 %v1216_v54, %v145_v44  ;;  %v150_v60 = vsub.s32 4294967266, %v145_v44  ;;  %v927_v63 = vmin.u32 %v244_v40, %v1250_v35 }
  0x4e   :  { %v329_v7 = vsel %vm315_vm0, %v326_v38, %v328_v2  ;;  %v396_v54 = vadd.s32 1, %v934_v1  ;;  %v160_v8 = vsub.s32 4, %v1206_v61  ;;  %v321_v13 = vsel %vm315_vm0, %v318_v37, %v320_v56 }
  0x4f   :  { %v148_v47 = vshrl.u32 %v130_v29, %v146_v42  ;;  %v151_v6 = vadd.s32 127, %v150_v60  ;;  %v246_v11 = vclz %v927_v63  ;;  %v393_v31 = vand.u32 8388607, %v386_v3 }
  0x50   :  { %v1282_v21 = vmul.u32.u64.low %v1233_v46, %v329_v7  ;;  %v1283_v23 = vmul.u32.u64.high %v1233_v46, %v329_v7, %v1282_v21  ;;  %v1286_v25 = vmul.u32.u64.low %v1233_v46, %v325_v0  ;;  %v1287_v26 = vmul.u32.u64.high %v1233_v46, %v325_v0, %v1286_v25 }
  0x51   :  { %v149_v14 = vor.u32 %v148_v47, %v147_v58  ;;  %v152_v20 = vshll.u32 %v151_v6, 23  ;;  %v928_v24 = vadd.s32 4294967294, %v246_v11  ;;  %vm397_vm3 = vcmp.gt.s32.totalorder %v396_v54, 0 }
  0x52   :  { %v398_v48 = vsel %vm397_vm3, %v396_v54, 0  ;;  %v161_v33 = vsel %vm76_vm2, %v160_v8, %v1206_v61  ;;  %v234_v34 = vadd.s32 %v1189_v28, %v1198_v32  ;;  %v337_v41 = vmul.u32 %v1233_v46, %v321_v13 }
  0x53   :  { %v153_v27 = vor.u32 4788187, %v152_v20  ;;  %v156_v29 = vcvt.s32.f32 %v149_v14  ;;  %vm929_vm4 = vcmp.lt.s32.totalorder %v928_v24, 0  ;;  %v400_v36 = vand.u32 31, %v398_v48 }
  0x54   :  { %v249_v37 = vsel %vm929_vm4, 0, %v928_v24  ;;  %vm339_vm5 = vc.u32 %v1283_v23, %v1286_v25  ;;  %v340_v56 = vadd.s32 1, %v1287_v26  ;;  %vm1304_vm6 = vcmp.le.f32.partialorder %v74_v19, 0.7853982 }
  0x55   :  { %v154_v1 = vand.u32 2147483647, %v153_v27  ;;  %v250_v43 = vsub.s32 32, %v249_v37  ;;  %v251_v44 = vshll.u32 %v1250_v35, %v249_v37  ;;  %v254_v40 = vsub.s32 4294967266, %v249_v37 }
  0x56   :  { %v394_v32 = vor.u32 8388608, %v393_v31  ;;  %v401_v38 = vsub.s32 32, %v400_v36  ;;  %v163_v46 = vsel %vm1304_vm6, 0, %v161_v33  ;;  %v341_v60 = vsel %vm339_vm5, %v340_v56, %v1287_v26 }
  0x57   :  { %v157_v28 = vmul.f32 %v156_v29, %v154_v1  ;;  %v252_v42 = vshrl.u32 %v234_v34, %v250_v43  ;;  %v255_v58 = vadd.s32 127, %v254_v40  ;;  %v342_v62 = vadd.s32 %v341_v60, %v337_v41 }
  0x58   :  { %v403_v63 = vshll.u32 %v1050_v51, %v400_v36  ;;  %v404_v0 = vshrl.u32 %v1051_v53, %v401_v38  ;;  %vm180_vm7 = vcmp.lt.s32.totalorder %v1096_v16, 0  ;;  %v406_v47 = vshll.u32 %v1051_v53, %v400_v36 }
  0x59   :  { %v158_v35 = vxor.u32 2147483648, %v157_v28  ;;  %v253_v19 = vor.u32 %v252_v42, %v251_v44  ;;  %v256_v2 = vshll.u32 %v255_v58, 23  ;;  %v407_v6 = vshrl.u32 %v1052_v55, %v401_v38 }
  0x5a   :  { %v167_v7 = vadd.s32 3, %v163_v46  ;;  %v343_v54 = vadd.s32 536870912, %v342_v62  ;;  %v399_v8 = vshrl.u32 %v398_v48, 5  ;;  %v412_v11 = vshll.u32 %v1053_v57, %v400_v36 }
  0x5b   :  { %v257_v13 = vor.u32 4788187, %v256_v2  ;;  %v260_v14 = vcvt.s32.f32 %v253_v19  ;;  %v409_v20 = vshll.u32 %v1052_v55, %v400_v36  ;;  %v410_v21 = vshrl.u32 %v1053_v57, %v401_v38 }
  0x5c   :  { %v159_v24 = vsel %vm76_vm2, %v158_v35, %v157_v28  ;;  %vm1323_vm8 = vcmp.le.f32.partialorder %v178_v22, 0.7853982  ;;  %v344_v27 = vshrl.u32 %v343_v54, 30  ;;  %v405_v29 = vor.u32 %v404_v0, %v403_v63 }
  0x5d   :  { %v413_v31 = vshrl.u32 %v1054_v59, %v401_v38  ;;  %v258_v48 = vand.u32 2147483647, %v257_v13  ;;  %v408_v33 = vor.u32 %v407_v6, %v406_v47  ;;  %v415_v34 = vshll.u32 %v1054_v59, %v400_v36 }
  0x5e   :  { %v416_v1 = vshrl.u32 %v1055_v4, %v401_v38  ;;  %v345_v37 = vshll.u32 %v344_v27, 30  ;;  %vm418_vm9 = vcmp.lt.s32.totalorder %v399_v8, 1  ;;  %v1330_v43 = vshll.u32 %v394_v32, 8 }
  0x5f   :  { %v414_v41 = vor.u32 %v413_v31, %v412_v11  ;;  %v162_v22 = vsel %vm1304_vm6, %v1093_v15, %v159_v24  ;;  %v261_v44 = vmul.f32 %v260_v14, %v258_v48  ;;  %v402_v40 = vshrl.u32 %v1050_v51, %v401_v38 }
  0x60   :  { %v411_v56 = vor.u32 %v410_v21, %v409_v20  ;;  %v1336_v28 = vsub.s32 %v342_v62, %v345_v37  ;;  %v417_v46 = vor.u32 %v416_v1, %v415_v34  ;;  %vm420_vm10 = vcmp.lt.s32.totalorder %v399_v8, 3 }
  0x61   :  { %vm421_vm11 = vcmp.lt.s32.totalorder %v399_v8, 4  ;;  %v262_v36 = vxor.u32 2147483648, %v261_v44  ;;  %vm419_vm12 = vcmp.lt.s32.totalorder %v399_v8, 2  ;;  %v426_v32 = vsel %vm418_vm9, %v405_v29, %v408_v33 }
  0x62   :  { %v423_v42 = vsel %vm421_vm11, %v411_v56, 2102212464  ;;  %993 = vcosq.f32 %v162_v22  ;;  %v264_v58 = vsub.s32 4, %v1238_v12  ;;  %v348_v61 = vsub.s32 0, %v1336_v28 }
  0x63   :  { %v427_v60 = vsel %vm421_vm11, %v414_v41, 920167782  ;;  %995 = vsinq.f32 %v162_v22  ;;  %v368_v38 = vsub.s32 4, %v344_v27  ;;  %v422_v35 = vsel %vm418_vm9, %v402_v40, %v405_v29 }
  0x64   :  { %v428_v62 = vsel %vm420_vm10, %v411_v56, %v427_v60  ;;  %v263_v63 = vsel %vm180_vm7, %v262_v36, %v261_v44  ;;  %v931_v0 = vmin.u32 %v348_v61, %v1336_v28  ;;  %v424_v19 = vsel %vm420_vm10, %v408_v33, %v423_v42 }
  0x65   :  { %v429_v2 = vsel %vm419_vm12, %v426_v32, %v428_v62  ;;  %v430_v47 = vsel %vm418_vm9, %v408_v33, %v411_v56  ;;  %v431_v6 = vsel %vm421_vm11, %v417_v46, 1326507024  ;;  %v59_v13 = vmul.f32 %v1084_v9, %v36_v50 }
  0x66   :  { %v1353_v54 = vmul.u32.u64.low %v1330_v43, %v429_v2  ;;  %v1354_v11 = vmul.u32.u64.high %v1330_v43, %v429_v2, %v1353_v54  ;;  %v60_v14 = vmul.f32 %v1084_v9, %v37_v52  ;;  %v1365_v20 = vadd.f32 %v1086_v10, %v1230_v5 }
  0x67   :  { %v350_v21 = vclz %v931_v0  ;;  %v1367_v24 = vand.u32 3, %v167_v7  ;;  %v266_v29 = vsel %vm1323_vm8, %v1096_v16, %v263_v63  ;;  %vm284_vm13 = vcmp.lt.s32.totalorder %v1099_v17, 0 }
  0x68   :  { %v432_v39 = vsel %vm420_vm10, %v414_v41, %v431_v6  ;;  %v265_v30 = vsel %vm180_vm7, %v264_v58, %v1238_v12  ;;  %v425_v50 = vsel %vm419_vm12, %v422_v35, %v424_v19  ;;  %v338_v5 = vadd.s32 %v1286_v25, %v1283_v23 }
  0x69   :  { %v932_v9 = vadd.s32 4294967294, %v350_v21  ;;  %v433_v52 = vsel %vm419_vm12, %v430_v47, %v432_v39  ;;  %v369_v7 = vsel %vm284_vm13, %v368_v38, %v344_v27  ;;  %997 = vcosq.f32 %v266_v29 }
  0x6a   :  { %v1384_v31 = vmul.u32.u64.low %v1330_v43, %v433_v52  ;;  %v1385_v48 = vmul.u32.u64.high %v1330_v43, %v433_v52, %v1384_v31  ;;  %v444_v33 = vadd.s32 1, %v1354_v11  ;;  %v490_v12 = vand.u32 2147483647, %v1365_v20 }
  0x6b   :  { %vm933_vm14 = vcmp.lt.s32.totalorder %v932_v9, 0  ;;  %999 = vsinq.f32 %v266_v29  ;;  %v441_v8 = vmul.u32 %v1330_v43, %v425_v50  ;;  %v493_v1 = vand.u32 2139095040, %v1365_v20 }
  0x6c   :  { %v353_v34 = vsel %vm933_vm14, 0, %v932_v9  ;;  %v994_v23 = vpop.eup %993  ;;  %vm1393_vm15 = vcmp.le.f32.partialorder %v282_v45, 0.7853982  ;;  %v267_v44 = vsel %vm1323_vm8, 0, %v265_v30  ;;  %vm443_vm0 = vc.u32 %v1385_v48, %v1353_v54 }
  0x6d   :  { %v354_v27 = vsub.s32 32, %v353_v34  ;;  %v355_v37 = vshll.u32 %v1336_v28, %v353_v34  ;;  %v358_v41 = vsub.s32 4294967266, %v353_v34  ;;  %v996_v22 = vpop.eup %995  ;;  %v371_v43 = vsel %vm1393_vm15, 0, %v369_v7 }
  0x6e   :  { %v494_v40 = vshrl.u32 %v493_v1, 23  ;;  %v445_v46 = vsel %vm443_vm0, %v444_v33, %v1354_v11  ;;  %v497_v36 = vand.u32 8388607, %v490_v12  ;;  %v1408_v28 = vadd.f32 %v1086_v10, %v59_v13 }
  0x6f   :  { %v356_v56 = vshrl.u32 %v338_v5, %v354_v27  ;;  %v359_v45 = vadd.s32 127, %v358_v41  ;;  %vm170_vm1 = vcmp.eq.s32.totalorder %v1367_v24, 0  ;;  %v446_v26 = vadd.s32 %v445_v46, %v441_v8 }
  0x70   :  { %v938_v42 = vadd.s32 4294967169, %v494_v40  ;;  %v271_v32 = vadd.s32 3, %v267_v44  ;;  %v375_v60 = vadd.s32 3, %v371_v43  ;;  %v171_v38 = vxor.u32 2147483648, %v996_v22 }
  0x71   :  { %v357_v58 = vor.u32 %v356_v56, %v355_v37  ;;  %v360_v61 = vshll.u32 %v359_v45, 23  ;;  %v174_v35 = vxor.u32 2147483648, %v994_v23  ;;  %v447_v62 = vadd.s32 536870912, %v446_v26 }
  0x72   :  { %v500_v63 = vadd.s32 1, %v938_v42  ;;  %vm173_vm2 = vcmp.eq.s32.totalorder %v1367_v24, 2  ;;  %v498_v2 = vor.u32 8388608, %v497_v36  ;;  %v1413_v47 = vadd.f32 %v1086_v10, %v60_v14 }
  0x73   :  { %v361_v0 = vor.u32 4788187, %v360_v61  ;;  %v364_v19 = vcvt.s32.f32 %v357_v58  ;;  %v448_v6 = vshrl.u32 %v447_v62, 30  ;;  %v597_v11 = vand.u32 2139095040, %v1408_v28  ;;  %v1416_v13 = vpop.eup %997 }
  0x74   :  { %vm501_vm3 = vcmp.gt.s32.totalorder %v500_v63, 0  ;;  %v1418_v21 = vand.u32 3, %v271_v32  ;;  %vm388_vm4 = vcmp.lt.s32.totalorder %v1204_v49, 0  ;;  %v1425_v9 = vsel %vm170_vm1, %v994_v23, %v171_v38 }
  0x75   :  { %v362_v29 = vand.u32 2147483647, %v361_v0  ;;  %v502_v39 = vsel %vm501_vm3, %v500_v63, 0  ;;  %v1421_v30 = vpop.eup %999  ;;  %v1427_v10 = vsel %vm173_vm2, %v174_v35, %v996_v22  ;;  %v1429_v14 = vand.u32 3, %v375_v60 }
  0x76   :  { %v449_v50 = vshll.u32 %v448_v6, 30  ;;  %v442_v5 = vadd.s32 %v1353_v54, %v1385_v48  ;;  %v504_v7 = vand.u32 31, %v502_v39  ;;  %v1433_v31 = vshll.u32 %v498_v2, 8 }
  0x77   :  { %v365_v52 = vmul.f32 %v364_v19, %v362_v29  ;;  %v278_v33 = vxor.u32 2147483648, %v1416_v13  ;;  %vm1438_vm5 = vcmp.le.f32.partialorder %v386_v3, 0.7853982  ;;  %v594_v1 = vand.u32 2147483647, %v1408_v28 }
  0x78   :  { %v1442_v8 = vsub.s32 %v446_v26, %v449_v50  ;;  %v598_v23 = vshrl.u32 %v597_v11, 23  ;;  %v275_v27 = vxor.u32 2147483648, %v1421_v30  ;;  %v472_v54 = vsub.s32 4, %v448_v6 }
  0x79   :  { %v366_v37 = vxor.u32 2147483648, %v365_v52  ;;  %v505_v48 = vsub.s32 32, %v504_v7  ;;  %v503_v22 = vshrl.u32 %v502_v39, 5  ;;  %v507_v44 = vshll.u32 %v1050_v51, %v504_v7 }
  0x7a   :  { %v452_v41 = vsub.s32 0, %v1442_v8  ;;  %v510_v3 = vshll.u32 %v1051_v53, %v504_v7  ;;  %v513_v45 = vshll.u32 %v1052_v55, %v504_v7  ;;  %v942_v26 = vadd.s32 4294967169, %v598_v23 }
  0x7b   :  { %v367_v43 = vsel %vm284_vm13, %v366_v37, %v365_v52  ;;  %v508_v40 = vshrl.u32 %v1051_v53, %v505_v48  ;;  %v511_v56 = vshrl.u32 %v1052_v55, %v505_v48  ;;  %v514_v36 = vshrl.u32 %v1053_v57, %v505_v48 }
  0x7c   :  { %v935_v46 = vmin.u32 %v452_v41, %v1442_v8  ;;  %v1458_v42 = vand.u32 8388607, %v594_v1  ;;  %v370_v32 = vsel %vm1393_vm15, %v1099_v17, %v367_v43  ;;  %v473_v58 = vsel %vm388_vm4, %v472_v54, %v448_v6 }
  0x7d   :  { %v506_v61 = vshrl.u32 %v1050_v51, %v505_v48  ;;  %v516_v60 = vshll.u32 %v1053_v57, %v504_v7  ;;  %vm274_vm6 = vcmp.eq.s32.totalorder %v1418_v21, 0  ;;  %vm277_vm7 = vcmp.eq.s32.totalorder %v1418_v21, 2 }
  0x7e   :  { %v454_v38 = vclz %v935_v46  ;;  %v509_v35 = vor.u32 %v508_v40, %v507_v44  ;;  %v512_v62 = vor.u32 %v511_v56, %v510_v3  ;;  %vm522_vm8 = vcmp.lt.s32.totalorder %v503_v22, 1 }
  0x7f   :  { %v515_v63 = vor.u32 %v514_v36, %v513_v45  ;;  %v517_v0 = vshrl.u32 %v1054_v59, %v505_v48  ;;  %v519_v25 = vshll.u32 %v1054_v59, %v504_v7  ;;  %vm523_vm9 = vcmp.lt.s32.totalorder %v503_v22, 2 }
  0x80   :  { %1001 = vcosq.f32 %v370_v32  ;;  %v936_v19 = vadd.s32 4294967294, %v454_v38  ;;  %v520_v2 = vshrl.u32 %v1055_v4, %v505_v48  ;;  %vm525_vm10 = vcmp.lt.s32.totalorder %v503_v22, 4 }
  0x81   :  { %v475_v6 = vsel %vm1438_vm5, 0, %v473_v58  ;;  %v518_v11 = vor.u32 %v517_v0, %v516_v60  ;;  %vm524_vm11 = vcmp.lt.s32.totalorder %v503_v22, 3  ;;  %v526_v29 = vsel %vm522_vm8, %v506_v61, %v509_v35 }
  0x82   :  { %vm937_vm12 = vcmp.lt.s32.totalorder %v936_v19, 0  ;;  %v521_v39 = vor.u32 %v520_v2, %v519_v25  ;;  %v527_v50 = vsel %vm525_vm10, %v515_v63, 2102212464  ;;  %v530_v52 = vsel %vm522_vm8, %v509_v35, %v512_v62 }
  0x83   :  { %v457_v7 = vsel %vm937_vm12, 0, %v936_v19  ;;  %v531_v23 = vsel %vm525_vm10, %v518_v11, 920167782  ;;  %v534_v37 = vsel %vm522_vm8, %v512_v62, %v515_v63  ;;  %v604_v54 = vadd.s32 1, %v942_v26 }
  0x84   :  { %v458_v48 = vsub.s32 32, %v457_v7  ;;  %v459_v41 = vshll.u32 %v1442_v8, %v457_v7  ;;  %v462_v44 = vsub.s32 4294967266, %v457_v7  ;;  %v532_v3 = vsel %vm524_vm11, %v515_v63, %v531_v23 }
  0x85   :  { %v528_v43 = vsel %vm524_vm11, %v512_v62, %v527_v50  ;;  %v533_v40 = vsel %vm523_vm9, %v530_v52, %v532_v3  ;;  %v535_v56 = vsel %vm525_vm10, %v521_v39, 1326507024  ;;  %vm605_vm13 = vcmp.gt.s32.totalorder %v604_v54, 0 }
  0x86   :  { %v460_v45 = vshrl.u32 %v442_v5, %v458_v48  ;;  %v463_v46 = vadd.s32 127, %v462_v44  ;;  %v536_v36 = vsel %vm524_vm11, %v518_v11, %v535_v56  ;;  %v606_v58 = vsel %vm605_vm13, %v604_v54, 0 }
  0x87   :  { %v479_v61 = vadd.s32 3, %v475_v6  ;;  %v537_v26 = vsel %vm523_vm9, %v534_v37, %v536_v36  ;;  %v1487_v8 = vmul.u32.u64.low %v1433_v31, %v533_v40  ;;  %v1488_v60 = vmul.u32.u64.high %v1433_v31, %v533_v40, %v1487_v8 }
  0x88   :  { %v461_v38 = vor.u32 %v460_v45, %v459_v41  ;;  %v464_v35 = vshll.u32 %v463_v46, 23  ;;  %v529_v62 = vsel %vm523_vm9, %v526_v29, %v528_v43  ;;  %v608_v63 = vand.u32 31, %v606_v58 }
  0x89   :  { %v1497_v5 = vsel %vm274_vm6, %v1416_v13, %v275_v27  ;;  %v1504_v0 = vsel %vm277_vm7, %v278_v33, %v1421_v30  ;;  %v1507_v25 = vmul.u32.u64.low %v1433_v31, %v537_v26  ;;  %v1508_v19 = vmul.u32.u64.high %v1433_v31, %v537_v26, %v1507_v25 }
  0x8a   :  { %v1510_v22 = vpop.eup %1001  ;;  %1003 = vsinq.f32 %v370_v32  ;;  %v465_v2 = vor.u32 4788187, %v464_v35  ;;  %v468_v6 = vcvt.s32.f32 %v461_v38  ;;  %v609_v11 = vsub.s32 32, %v608_v63 }
  0x8b   :  { %v545_v27 = vmul.u32 %v1433_v31, %v529_v62  ;;  %v548_v29 = vadd.s32 1, %v1488_v60  ;;  %v611_v13 = vshll.u32 %v1050_v51, %v608_v63  ;;  %v614_v39 = vshll.u32 %v1051_v53, %v608_v63 }
  0x8c   :  { %v466_v30 = vand.u32 2147483647, %v465_v2  ;;  %v1516_v33 = vand.u32 3, %v479_v61  ;;  %v602_v50 = vor.u32 8388608, %v1458_v42  ;;  %v612_v52 = vshrl.u32 %v1051_v53, %v609_v11 }
  0x8d   :  { %v382_v32 = vxor.u32 2147483648, %v1510_v22  ;;  %vm547_vm14 = vc.u32 %v1508_v19, %v1487_v8  ;;  %v607_v7 = vshrl.u32 %v606_v58, 5  ;;  %v615_v31 = vshrl.u32 %v1052_v55, %v609_v11 }
  0x8e   :  { %v469_v23 = vmul.f32 %v468_v6, %v466_v30  ;;  %v549_v37 = vsel %vm547_vm14, %v548_v29, %v1488_v60  ;;  %v613_v54 = vor.u32 %v612_v52, %v611_v13  ;;  %v617_v48 = vshll.u32 %v1052_v55, %v608_v63 }
  0x8f   :  { %v550_v41 = vadd.s32 %v549_v37, %v545_v27  ;;  %v616_v44 = vor.u32 %v615_v31, %v614_v39  ;;  %v618_v42 = vshrl.u32 %v1053_v57, %v609_v11  ;;  %v620_v3 = vshll.u32 %v1053_v57, %v608_v63 }
  0x90   :  { %vm169_vm15 = vcmp.lt.s32.totalorder %v1367_v24, 2  ;;  %v470_v43 = vxor.u32 2147483648, %v469_v23  ;;  %v621_v40 = vshrl.u32 %v1054_v59, %v609_v11  ;;  %v623_v56 = vshll.u32 %v1054_v59, %v608_v63 }
  0x91   :  { %v624_v45 = vshrl.u32 %v1055_v4, %v609_v11  ;;  %vm273_vm0 = vcmp.lt.s32.totalorder %v1418_v21, 2  ;;  %v551_v46 = vadd.s32 536870912, %v550_v41  ;;  %v610_v36 = vshrl.u32 %v1050_v51, %v609_v11 }
  0x92   :  { %v619_v58 = vor.u32 %v618_v42, %v617_v48  ;;  %vm626_vm1 = vcmp.lt.s32.totalorder %v607_v7, 1  ;;  %v471_v61 = vsel %vm388_vm4, %v470_v43, %v469_v23  ;;  %v622_v26 = vor.u32 %v621_v40, %v620_v3 }
  0x93   :  { %v625_v60 = vor.u32 %v624_v45, %v623_v56  ;;  %vm629_vm2 = vcmp.lt.s32.totalorder %v607_v7, 4  ;;  %v474_v38 = vsel %vm1438_vm5, %v1204_v49, %v471_v61  ;;  %v552_v35 = vshrl.u32 %v551_v46, 30 }
  0x94   :  { %vm628_vm3 = vcmp.lt.s32.totalorder %v607_v7, 3  ;;  %v631_v62 = vsel %vm629_vm2, %v619_v58, 2102212464  ;;  %v1004_v63 = vpop.eup %1003  ;;  %1005 = vcosq.f32 %v474_v38  ;;  %vm627_vm6 = vcmp.lt.s32.totalorder %v607_v7, 2 }
  0x95   :  { %v634_v25 = vsel %vm626_vm1, %v613_v54, %v616_v44  ;;  %v635_v2 = vsel %vm629_vm2, %v622_v26, 920167782  ;;  %vm377_vm4 = vcmp.lt.s32.totalorder %v1429_v14, 2  ;;  %1007 = vsinq.f32 %v474_v38 }
  0x96   :  { %v553_v6 = vshll.u32 %v552_v35, 30  ;;  %v630_v11 = vsel %vm626_vm1, %v610_v36, %v613_v54  ;;  %v632_v34 = vsel %vm628_vm3, %v616_v44, %v631_v62  ;;  %v636_v27 = vsel %vm628_vm3, %v619_v58, %v635_v2 }
  0x97   :  { %v638_v29 = vsel %vm626_vm1, %v616_v44, %v619_v58  ;;  %v639_v13 = vsel %vm629_vm2, %v625_v60, 1326507024  ;;  %v642_v39 = vshll.u32 %v602_v50, 8  ;;  %v576_v52 = vsub.s32 4, %v552_v35 }
  0x98   :  { %v1548_v30 = vsub.s32 %v550_v41, %v553_v6  ;;  %v637_v31 = vsel %vm627_vm6, %v634_v25, %v636_v27  ;;  %v640_v23 = vsel %vm628_vm3, %v622_v26, %v639_v13  ;;  %v379_v37 = vxor.u32 2147483648, %v1004_v63 }
  0x99   :  { %v641_v48 = vsel %vm627_vm6, %v638_v29, %v640_v23  ;;  %v1553_v54 = vmul.u32.u64.low %v642_v39, %v637_v31  ;;  %v1554_v42 = vmul.u32.u64.high %v642_v39, %v637_v31, %v1553_v54  ;;  %vm166_vm5 = vweird.f32 %v1093_v15 }
  0x9a   :  { %vm270_vm7 = vweird.f32 %v1096_v16  ;;  %v556_v50 = vsub.s32 0, %v1548_v30  ;;  %v633_v41 = vsel %vm627_vm6, %v630_v11, %v632_v34  ;;  %vm378_vm8 = vcmp.eq.s32.totalorder %v1429_v14, 0 }
  0x9b   :  { %v1561_v44 = vmul.u32.u64.low %v642_v39, %v641_v48  ;;  %v1562_v3 = vmul.u32.u64.high %v642_v39, %v641_v48, %v1561_v44  ;;  %vm381_vm9 = vcmp.eq.s32.totalorder %v1429_v14, 2  ;;  %vm1568_vm10 = vcmp.le.f32.partialorder %v490_v12, 0.7853982 }
  0x9c   :  { %vm492_vm11 = vcmp.lt.s32.totalorder %v1365_v20, 0  ;;  %v176_v7 = vsel %vm169_vm15, %v1425_v9, %v1427_v10  ;;  %vm374_vm12 = vweird.f32 %v1099_v17  ;;  %v939_v40 = vmin.u32 %v556_v50, %v1548_v30 }
  0x9d   :  { %v577_v56 = vsel %vm492_vm11, %v576_v52, %v552_v35  ;;  %v701_v45 = vand.u32 2139095040, %v1413_v47  ;;  %v280_v12 = vsel %vm273_vm0, %v1497_v5, %v1504_v0  ;;  %vm481_vm13 = vcmp.lt.s32.totalorder %v1516_v33, 2 }
  0x9e   :  { %v649_v46 = vmul.u32 %v642_v39, %v633_v41  ;;  %v652_v24 = vadd.s32 1, %v1554_v42  ;;  %v380_v9 = vsel %vm378_vm8, %v1510_v22, %v379_v37  ;;  %v383_v10 = vsel %vm381_vm9, %v382_v32, %v1004_v63  ;;  %v1006_v61 = vpop.eup %1005 }
  0x9f   :  { %v558_v36 = vclz %v939_v40  ;;  %v698_v58 = vand.u32 2147483647, %v1413_v47  ;;  %vm478_vm14 = vweird.f32 %v1204_v49  ;;  %vm482_vm15 = vcmp.eq.s32.totalorder %v1516_v33, 0  ;;  %v1008_v0 = vpop.eup %1007 }
  0xa0   :  { %v579_v21 = vsel %vm1568_vm10, 0, %v577_v56  ;;  %vm651_vm0 = vc.u32 %v1562_v3, %v1553_v54  ;;  %v702_v5 = vshrl.u32 %v701_v45, 23  ;;  %vm485_vm1 = vcmp.eq.s32.totalorder %v1516_v33, 2 }
  0xa1   :  { %v486_v22 = vxor.u32 2147483648, %v1006_v61  ;;  %v940_v32 = vadd.s32 4294967294, %v558_v36  ;;  %v653_v26 = vsel %vm651_vm0, %v652_v24, %v1554_v42  ;;  %v384_v60 = vsel %vm377_vm4, %v380_v9, %v383_v10 }
  0xa2   :  { %v483_v38 = vxor.u32 2147483648, %v1008_v0  ;;  %v654_v35 = vadd.s32 %v653_v26, %v649_v46  ;;  %v946_v62 = vadd.s32 4294967169, %v702_v5  ;;  %v546_v63 = vadd.s32 %v1487_v8, %v1508_v19 }
  0xa3   :  { %vm941_vm2 = vcmp.lt.s32.totalorder %v940_v32, 0  ;;  %v583_v25 = vadd.s32 3, %v579_v21  ;;  %v705_v2 = vand.u32 8388607, %v698_v58  ;;  %v487_v6 = vsel %vm485_vm1, %v486_v22, %v1008_v0 }
  0xa4   :  { %v561_v11 = vsel %vm941_vm2, 0, %v940_v32  ;;  %v655_v34 = vadd.s32 536870912, %v654_v35  ;;  %v708_v27 = vadd.s32 1, %v946_v62  ;;  %v484_v29 = vsel %vm482_vm15, %v1006_v61, %v483_v38 }
  0xa5   :  { %v562_v14 = vsub.s32 32, %v561_v11  ;;  %v563_v13 = vshll.u32 %v1548_v30, %v561_v11  ;;  %v566_v39 = vsub.s32 4294967266, %v561_v11  ;;  %v1611_v52 = vsel %vm166_vm5, nan, %v176_v7 }
  0xa6   :  { %v1615_v8 = vsel %vm270_vm7, nan, %v280_v12  ;;  %v1617_v19 = vshrl.u32 %v655_v34, 30  ;;  %vm709_vm3 = vcmp.gt.s32.totalorder %v708_v27, 0  ;;  %v706_v37 = vor.u32 8388608, %v705_v2 }
  0xa7   :  { %v564_v31 = vshrl.u32 %v546_v63, %v562_v14  ;;  %v567_v23 = vadd.s32 127, %v566_v39  ;;  %v710_v48 = vsel %vm709_vm3, %v708_v27, 0  ;;  %v1621_v42 = vsel %vm374_vm12, nan, %v384_v60 }
  0xa8   :  { %v488_v15 = vsel %vm481_vm13, %v484_v29, %v487_v6  ;;  %v657_v30 = vshll.u32 %v1617_v19, 30  ;;  %v712_v50 = vand.u32 31, %v710_v48  ;;  %v1626_v44 = vand.u32 3, %v583_v25 }
  0xa9   :  { %v565_v16 = vor.u32 %v564_v31, %v563_v13  ;;  %v568_v41 = vshll.u32 %v567_v23, 23  ;;  %v650_v7 = vadd.s32 %v1553_v54, %v1562_v3  ;;  %v802_v17 = vand.u32 2147483647, %v1102_v18 }
  0xaa   :  { %v1630_v40 = vsub.s32 %v654_v35, %v657_v30  ;;  %v713_v56 = vsub.s32 32, %v712_v50  ;;  %v805_v45 = vand.u32 2139095040, %v1102_v18  ;;  %v1636_v33 = vsel %vm478_vm14, nan, %v488_v15 }
  0xab   :  { %v569_v12 = vor.u32 4788187, %v568_v41  ;;  %v572_v46 = vcvt.s32.f32 %v565_v16  ;;  %v1638_v24 = vshll.u32 %v706_v37, 8  ;;  %v715_v10 = vshll.u32 %v1050_v51, %v712_v50 }
  0xac   :  { %v660_v9 = vsub.s32 0, %v1630_v40  ;;  %v716_v54 = vshrl.u32 %v1051_v53, %v713_v56  ;;  %v718_v3 = vshll.u32 %v1051_v53, %v712_v50  ;;  %v719_v61 = vshrl.u32 %v1052_v55, %v713_v56 }
  0xad   :  { %v570_v36 = vand.u32 2147483647, %v569_v12  ;;  %v721_v21 = vshll.u32 %v1052_v55, %v712_v50  ;;  %v722_v49 = vshrl.u32 %v1053_v57, %v713_v56  ;;  %v711_v0 = vshrl.u32 %v710_v48, 5 }
  0xae   :  { %v943_v5 = vmin.u32 %v660_v9, %v1630_v40  ;;  %v724_v22 = vshll.u32 %v1053_v57, %v712_v50  ;;  %v806_v32 = vshrl.u32 %v805_v45, 23  ;;  %v680_v60 = vsub.s32 4, %v1617_v19 }
  0xaf   :  { %v573_v26 = vmul.f32 %v572_v46, %v570_v36  ;;  %v714_v38 = vshrl.u32 %v1050_v51, %v713_v56  ;;  %v725_v35 = vshrl.u32 %v1054_v59, %v713_v56  ;;  %v717_v63 = vor.u32 %v716_v54, %v715_v10 }
  0xb0   :  { %v662_v62 = vclz %v943_v5  ;;  %v720_v25 = vor.u32 %v719_v61, %v718_v3  ;;  %v723_v2 = vor.u32 %v722_v49, %v721_v21  ;;  %v727_v34 = vshll.u32 %v1054_v59, %v712_v50 }
  0xb1   :  { %v574_v6 = vxor.u32 2147483648, %v573_v26  ;;  %v726_v11 = vor.u32 %v725_v35, %v724_v22  ;;  %v728_v27 = vshrl.u32 %v1055_v4, %v713_v56  ;;  %vm730_vm6 = vcmp.lt.s32.totalorder %v711_v0, 1 }
  0xb2   :  { %v944_v29 = vadd.s32 4294967294, %v662_v62  ;;  %vm731_vm4 = vcmp.lt.s32.totalorder %v711_v0, 2  ;;  %vm732_vm5 = vcmp.lt.s32.totalorder %v711_v0, 3  ;;  %vm733_vm7 = vcmp.lt.s32.totalorder %v711_v0, 4 }
  0xb3   :  { %v575_v14 = vsel %vm492_vm11, %v574_v6, %v573_v26  ;;  %v729_v13 = vor.u32 %v728_v27, %v727_v34  ;;  %v734_v39 = vsel %vm730_vm6, %v714_v38, %v717_v63  ;;  %v735_v23 = vsel %vm733_vm7, %v723_v2, 2102212464 }
  0xb4   :  { %v578_v31 = vsel %vm1568_vm10, %v1365_v20, %v575_v14  ;;  %vm945_vm8 = vcmp.lt.s32.totalorder %v944_v29, 0  ;;  %v738_v37 = vsel %vm730_vm6, %v717_v63, %v720_v25  ;;  %v736_v15 = vsel %vm732_vm5, %v720_v25, %v735_v23 }
  0xb5   :  { %1009 = vcosq.f32 %v578_v31  ;;  %v665_v48 = vsel %vm945_vm8, 0, %v944_v29  ;;  %v739_v30 = vsel %vm733_vm7, %v726_v11, 920167782  ;;  %v742_v43 = vsel %vm730_vm6, %v720_v25, %v723_v2 }
  0xb6   :  { %1011 = vsinq.f32 %v578_v31  ;;  %v666_v50 = vsub.s32 32, %v665_v48  ;;  %v667_v16 = vshll.u32 %v1630_v40, %v665_v48  ;;  %v670_v41 = vsub.s32 4294967266, %v665_v48 }
  0xb7   :  { %v740_v56 = vsel %vm732_vm5, %v723_v2, %v739_v30  ;;  %v743_v45 = vsel %vm733_vm7, %v729_v13, 1326507024  ;;  %v950_v12 = vadd.s32 4294967169, %v806_v32  ;;  %v737_v3 = vsel %vm731_vm4, %v734_v39, %v736_v15 }
  0xb8   :  { %v668_v46 = vshrl.u32 %v650_v7, %v666_v50  ;;  %v671_v9 = vadd.s32 127, %v670_v41  ;;  %v741_v10 = vsel %vm731_vm4, %v738_v37, %v740_v56  ;;  %v744_v54 = vsel %vm732_vm5, %v726_v11, %v743_v45 }
  0xb9   :  { %v745_v36 = vsel %vm731_vm4, %v742_v43, %v744_v54  ;;  %v1673_v40 = vmul.u32.u64.low %v1638_v24, %v741_v10  ;;  %v1674_v61 = vmul.u32.u64.high %v1638_v24, %v741_v10, %v1673_v40  ;;  %vm582_vm9 = vweird.f32 %v1365_v20 }
  0xba   :  { %v669_v21 = vor.u32 %v668_v46, %v667_v16  ;;  %v672_v49 = vshll.u32 %v671_v9, 23  ;;  %v1679_v7 = vmul.u32.u64.low %v1638_v24, %v745_v36  ;;  %v1680_v5 = vmul.u32.u64.high %v1638_v24, %v745_v36, %v1679_v7 }
  0xbb   :  { %vm596_vm10 = vcmp.lt.s32.totalorder %v1408_v28, 0  ;;  %v1685_v22 = vand.u32 8388607, %v802_v17  ;;  %v812_v0 = vadd.s32 1, %v950_v12  ;;  %vm906_vm11 = vcmask 261120  }
  0xbc   :  { %vm1689_vm12 = vcmp.le.f32.partialorder %v594_v1, 0.7853982  ;;  %v673_v26 = vor.u32 4788187, %v672_v49  ;;  %v676_v38 = vcvt.s32.f32 %v669_v21  ;;  %v753_v35 = vmul.u32 %v1638_v24, %v737_v3  ;;  %907 = vst.msk [vmem:[%s1805_s1] sm:$0xff] %vm906_vm11, %v1611_v52  ;;  %908 = vst.msk [vmem:[%s1805_s1 + $0x8] sm:$0xff] %vm906_vm11, %v1615_v8 }
  0xbd   :  { %909 = vst.msk [vmem:[%s1805_s1 + $0x10] sm:$0xff] %vm906_vm11, %v1621_v42  ;;  %910 = vst.msk [vmem:[%s1805_s1 + $0x18] sm:$0xff] %vm906_vm11, %v1636_v33  ;;  %vm585_vm13 = vcmp.lt.s32.totalorder %v1626_v44, 2  ;;  %v681_v1 = vsel %vm596_vm10, %v680_v60, %v1617_v19  ;;  %v756_v52 = vadd.s32 1, %v1674_v61  ;;  %vm813_vm14 = vcmp.gt.s32.totalorder %v812_v0, 0 }
  0xbe   :  { %vm586_vm15 = vcmp.eq.s32.totalorder %v1626_v44, 0  ;;  %v674_v8 = vand.u32 2147483647, %v673_v26  ;;  %vm755_vm0 = vc.u32 %v1680_v5, %v1673_v40  ;;  %v814_v42 = vsel %vm813_vm14, %v812_v0, 0 }
  0xbf   :  { %v1010_v24 = vpop.eup %1009  ;;  %vm589_vm1 = vcmp.eq.s32.totalorder %v1626_v44, 2  ;;  %v757_v33 = vsel %vm755_vm0, %v756_v52, %v1674_v61  ;;  %v810_v62 = vor.u32 8388608, %v1685_v22  ;;  %v816_v63 = vand.u32 31, %v814_v42 }
  0xc0   :  { %v1012_v25 = vpop.eup %1011  ;;  %v590_v19 = vxor.u32 2147483648, %v1010_v24  ;;  %v677_v60 = vmul.f32 %v676_v38, %v674_v8  ;;  %v683_v2 = vsel %vm1689_vm12, 0, %v681_v1  ;;  %v758_v6 = vadd.s32 %v757_v33, %v753_v35 }
  0xc1   :  { %v587_v11 = vxor.u32 2147483648, %v1012_v25  ;;  %v815_v34 = vshrl.u32 %v814_v42, 5  ;;  %v817_v27 = vsub.s32 32, %v816_v63  ;;  %v819_v29 = vshll.u32 %v1050_v51, %v816_v63 }
  0xc2   :  { %v591_v14 = vsel %vm589_vm1, %v590_v19, %v1012_v25  ;;  %v678_v13 = vxor.u32 2147483648, %v677_v60  ;;  %v759_v39 = vadd.s32 536870912, %v758_v6  ;;  %v822_v31 = vshll.u32 %v1051_v53, %v816_v63 }
  0xc3   :  { %v588_v23 = vsel %vm586_vm15, %v1010_v24, %v587_v11  ;;  %v820_v37 = vshrl.u32 %v1051_v53, %v817_v27  ;;  %v823_v48 = vshrl.u32 %v1052_v55, %v817_v27  ;;  %v825_v15 = vshll.u32 %v1052_v55, %v816_v63 }
  0xc4   :  { %v592_v30 = vsel %vm585_vm13, %v588_v23, %v591_v14  ;;  %v679_v50 = vsel %vm596_vm10, %v678_v13, %v677_v60  ;;  %v1738_v16 = vshrl.u32 %v759_v39, 30  ;;  %v826_v41 = vshrl.u32 %v1053_v57, %v817_v27 }
  0xc5   :  { %v593_v56 = vsel %vm582_vm9, nan, %v592_v30  ;;  %v682_v53 = vsel %vm1689_vm12, %v1408_v28, %v679_v50  ;;  %v687_v43 = vadd.s32 3, %v683_v2  ;;  %v818_v55 = vshrl.u32 %v1050_v51, %v817_v27 }
  0xc6   :  { %1013 = vcosq.f32 %v682_v53  ;;  %v761_v44 = vshll.u32 %v1738_v16, 30  ;;  %v821_v45 = vor.u32 %v820_v37, %v819_v29  ;;  %v824_v12 = vor.u32 %v823_v48, %v822_v31  ;;  %911 = vst.msk [vmem:[%s1805_s1 + $0x20] sm:$0xff] %vm906_vm11, %v593_v56 }
  0xc7   :  { %1015 = vsinq.f32 %v682_v53  ;;  %v828_v20 = vshll.u32 %v1053_v57, %v816_v63  ;;  %v829_v46 = vshrl.u32 %v1054_v59, %v817_v27  ;;  %v831_v9 = vshll.u32 %v1054_v59, %v816_v63 }
  0xc8   :  { %v762_v10 = vsub.s32 %v758_v6, %v761_v44  ;;  %v827_v54 = vor.u32 %v826_v41, %v825_v15  ;;  %v832_v51 = vshrl.u32 %v1055_v4, %v817_v27  ;;  %vm834_vm2 = vcmp.lt.s32.totalorder %v815_v34, 1 }
  0xc9   :  { %v830_v3 = vor.u32 %v829_v46, %v828_v20  ;;  %vm836_vm3 = vcmp.lt.s32.totalorder %v815_v34, 3  ;;  %vm835_vm6 = vcmp.lt.s32.totalorder %v815_v34, 2  ;;  %vm837_vm4 = vcmp.lt.s32.totalorder %v815_v34, 4 }
  0xca   :  { %v764_v36 = vsub.s32 0, %v762_v10  ;;  %v833_v61 = vor.u32 %v832_v51, %v831_v9  ;;  %v839_v21 = vsel %vm837_vm4, %v827_v54, 2102212464  ;;  %v842_v49 = vsel %vm834_vm2, %v821_v45, %v824_v12 }
  0xcb   :  { %v843_v7 = vsel %vm837_vm4, %v830_v3, 920167782  ;;  %v850_v57 = vshll.u32 %v810_v62, 8  ;;  %v688_v22 = vand.u32 3, %v687_v43  ;;  %v838_v59 = vsel %vm834_vm2, %v818_v55, %v821_v45 }
  0xcc   :  { %v947_v0 = vmin.u32 %v764_v36, %v762_v10  ;;  %v844_v32 = vsel %vm836_vm3, %v827_v54, %v843_v7  ;;  %v840_v4 = vsel %vm836_vm3, %v824_v12, %v839_v21  ;;  %v846_v38 = vsel %vm834_vm2, %v824_v12, %v827_v54 }
  0xcd   :  { %v845_v26 = vsel %vm835_vm6, %v842_v49, %v844_v32  ;;  %v847_v35 = vsel %vm837_vm4, %v833_v61, 1326507024  ;;  %vm686_vm5 = vweird.f32 %v1408_v28  ;;  %vm693_vm7 = vcmp.eq.s32.totalorder %v688_v22, 2 }
  0xce   :  { %v766_v1 = vclz %v947_v0  ;;  %v848_v52 = vsel %vm836_vm3, %v830_v3, %v847_v35  ;;  %v1764_v8 = vmul.u32.u64.low %v850_v57, %v845_v26  ;;  %v1765_v42 = vmul.u32.u64.high %v850_v57, %v845_v26, %v1764_v8 }
  0xcf   :  { %v841_v62 = vsel %vm835_vm6, %v838_v59, %v840_v4  ;;  %v849_v63 = vsel %vm835_vm6, %v846_v38, %v848_v52  ;;  %vm690_vm8 = vcmp.eq.s32.totalorder %v688_v22, 0  ;;  %vm689_vm9 = vcmp.lt.s32.totalorder %v688_v22, 2 }
  0xd0   :  { %v1014_v24 = vpop.eup %1013  ;;  %v948_v33 = vadd.s32 4294967294, %v766_v1  ;;  %v1769_v60 = vmul.u32.u64.low %v850_v57, %v849_v63  ;;  %v1770_v2 = vmul.u32.u64.high %v850_v57, %v849_v63, %v1769_v60  ;;  %v754_v11 = vadd.s32 %v1673_v40, %v1680_v5 }
  0xd1   :  { %v1016_v25 = vpop.eup %1015  ;;  %v694_v19 = vxor.u32 2147483648, %v1014_v24  ;;  %v857_v14 = vmul.u32 %v850_v57, %v841_v62  ;;  %v860_v13 = vadd.s32 1, %v1765_v42  ;;  %v784_v28 = vsub.s32 4, %v1738_v16 }
  0xd2   :  { %v691_v6 = vxor.u32 2147483648, %v1016_v25  ;;  %vm949_vm10 = vcmp.lt.s32.totalorder %v948_v33, 0  ;;  %vm859_vm12 = vc.u32 %v1770_v2, %v1764_v8  ;;  %vm700_vm13 = vcmp.lt.s32.totalorder %v1413_v47, 0 }
  0xd3   :  { %v695_v27 = vsel %vm693_vm7, %v694_v19, %v1016_v25  ;;  %v769_v29 = vsel %vm949_vm10, 0, %v948_v33  ;;  %v861_v40 = vsel %vm859_vm12, %v860_v13, %v1765_v42  ;;  %vm699_vm14 = vcmp.le.f32.partialorder %v698_v58, 0.7853982 }
  0xd4   :  { %v692_v39 = vsel %vm690_vm8, %v1014_v24, %v691_v6  ;;  %v770_v34 = vsub.s32 32, %v769_v29  ;;  %v771_v31 = vshll.u32 %v762_v10, %v769_v29  ;;  %v774_v23 = vsub.s32 4294967266, %v769_v29 }
  0xd5   :  { %v696_v37 = vsel %vm689_vm9, %v692_v39, %v695_v27  ;;  %v862_v5 = vadd.s32 %v861_v40, %v857_v14  ;;  %v785_v9 = vsel %vm700_vm13, %v784_v28, %v1738_v16  ;;  %v858_v7 = vadd.s32 %v1764_v8, %v1770_v2 }
  0xd6   :  { %v697_v48 = vsel %vm686_vm5, nan, %v696_v37  ;;  %v772_v15 = vshrl.u32 %v754_v11, %v770_v34  ;;  %v775_v30 = vadd.s32 127, %v774_v23  ;;  %v787_v3 = vsel %vm699_vm14, 0, %v785_v9 }
  0xd7   :  { %912 = vst.msk [vmem:[%s1805_s1 + $0x28] sm:$0xff] %vm906_vm11, %v697_v48  ;;  %v863_v56 = vadd.s32 536870912, %v862_v5  ;;  %v791_v21 = vadd.s32 3, %v787_v3  ;;  %vm790_vm3 = vweird.f32 %v1413_v47  ;;  %vm804_vm6 = vcmp.lt.s32.totalorder %v1102_v18, 0 }
  0xd8   :  { %v773_v50 = vor.u32 %v772_v15, %v771_v31  ;;  %v776_v41 = vshll.u32 %v775_v30, 23  ;;  %vm803_vm4 = vcmp.le.f32.partialorder %v802_v17, 0.7853982  ;;  %vm894_vm9 = vweird.f32 %v1102_v18 }
  0xd9   :  { %v864_v55 = vshrl.u32 %v863_v56, 30  ;;  %v792_v57 = vand.u32 3, %v791_v21 }
  0xda   :  { %v777_v53 = vor.u32 4788187, %v776_v41  ;;  %v780_v43 = vcvt.s32.f32 %v773_v50 }
  0xdb   :  { %v865_v45 = vshll.u32 %v864_v55, 30  ;;  %vm797_vm0 = vcmp.eq.s32.totalorder %v792_v57, 2  ;;  %vm794_vm1 = vcmp.eq.s32.totalorder %v792_v57, 0  ;;  %vm793_vm2 = vcmp.lt.s32.totalorder %v792_v57, 2 }
  0xdc   :  { %v778_v44 = vand.u32 2147483647, %v777_v53  ;;  %v888_v25 = vsub.s32 4, %v864_v55 }
  0xdd   :  { %v866_v20 = vsub.s32 %v862_v5, %v865_v45 }
  0xde   :  { %v781_v12 = vmul.f32 %v780_v43, %v778_v44  ;;  %v889_v2 = vsel %vm804_vm6, %v888_v25, %v864_v55 }
  0xdf   :  { %v868_v10 = vsub.s32 0, %v866_v20  ;;  %v891_v27 = vsel %vm803_vm4, 0, %v889_v2 }
  0xe0   :  { %v782_v46 = vxor.u32 2147483648, %v781_v12  ;;  %v895_v29 = vadd.s32 3, %v891_v27 }
  0xe1   :  { %v951_v36 = vmin.u32 %v868_v10, %v866_v20 }
  0xe2   :  { %v783_v54 = vsel %vm700_vm13, %v782_v46, %v781_v12  ;;  %v896_v14 = vand.u32 3, %v895_v29 }
  0xe3   :  { %v786_v51 = vsel %vm699_vm14, %v1413_v47, %v783_v54  ;;  %v870_v61 = vclz %v951_v36 }
  0xe4   :  { %1017 = vcosq.f32 %v786_v51  ;;  %vm901_vm5 = vcmp.eq.s32.totalorder %v896_v14, 2  ;;  %vm898_vm7 = vcmp.eq.s32.totalorder %v896_v14, 0  ;;  %vm897_vm8 = vcmp.lt.s32.totalorder %v896_v14, 2 }
  0xe5   :  { %1019 = vsinq.f32 %v786_v51  ;;  %v952_v49 = vadd.s32 4294967294, %v870_v61 }
  0xe7   :  { %vm953_vm15 = vcmp.lt.s32.totalorder %v952_v49, 0 }
  0xe8   :  { %v873_v22 = vsel %vm953_vm15, 0, %v952_v49 }
  0xe9   :  { %v874_v58 = vsub.s32 32, %v873_v22  ;;  %v875_v0 = vshll.u32 %v866_v20, %v873_v22  ;;  %v878_v59 = vsub.s32 4294967266, %v873_v22 }
  0xeb   :  { %v876_v16 = vshrl.u32 %v858_v7, %v874_v58  ;;  %v879_v32 = vadd.s32 127, %v878_v59 }
  0xed   :  { %v877_v35 = vor.u32 %v876_v16, %v875_v0  ;;  %v880_v1 = vshll.u32 %v879_v32, 23 }
  0xee   :  { %v1018_v4 = vpop.eup %1017 }
  0xef   :  { %v1020_v26 = vpop.eup %1019  ;;  %v798_v38 = vxor.u32 2147483648, %v1018_v4  ;;  %v881_v42 = vor.u32 4788187, %v880_v1  ;;  %v884_v24 = vcvt.s32.f32 %v877_v35 }
  0xf0   :  { %v795_v52 = vxor.u32 2147483648, %v1020_v26 }
  0xf1   :  { %v799_v8 = vsel %vm797_vm0, %v798_v38, %v1020_v26  ;;  %v882_v63 = vand.u32 2147483647, %v881_v42 }
  0xf2   :  { %v796_v33 = vsel %vm794_vm1, %v1018_v4, %v795_v52 }
  0xf3   :  { %v800_v62 = vsel %vm793_vm2, %v796_v33, %v799_v8  ;;  %v885_v60 = vmul.f32 %v884_v24, %v882_v63 }
  0xf4   :  { %v801_v19 = vsel %vm790_vm3, nan, %v800_v62 }
  0xf5   :  { %913 = vst.msk [vmem:[%s1805_s1 + $0x30] sm:$0xff] %vm906_vm11, %v801_v19  ;;  %v886_v47 = vxor.u32 2147483648, %v885_v60 }
  0xf7   :  { %v887_v6 = vsel %vm804_vm6, %v886_v47, %v885_v60 }
  0xf8   :  { %v890_v11 = vsel %vm803_vm4, %v1102_v18, %v887_v6 }
  0xf9   :  { %1021 = vcosq.f32 %v890_v11 }
  0xfa   :  { %1023 = vsinq.f32 %v890_v11 }
 0x103   :  { %v1022_v13 = vpop.eup %1021 }
 0x104   :  { %v1024_v39 = vpop.eup %1023  ;;  %v902_v34 = vxor.u32 2147483648, %v1022_v13 }
 0x105   :  { %v899_v31 = vxor.u32 2147483648, %v1024_v39 }
 0x106   :  { %v903_v17 = vsel %vm901_vm5, %v902_v34, %v1024_v39 }
 0x107   :  { %v900_v23 = vsel %vm898_vm7, %v1022_v13, %v899_v31 }
 0x108   :  { %v904_v37 = vsel %vm897_vm8, %v900_v23, %v903_v17 }
 0x109   :  { %v905_v48 = vsel %vm894_vm9, nan, %v904_v37 }
 0x10a   :  { %914 = vst.msk [vmem:[%s1805_s1 + $0x38] sm:$0xff] %vm906_vm11, %v905_v48 }
 0x10b   :  { %919 = vsyncpa [#allocation3], 1 }

</bundles_post_ra>
